<compile_context>
chip_gen: v6e
topology: v6e:2x2x1
jax: 0.10.0
libtpu: 0.0.40
codegen_flags: <defaults>
</compile_context>

<pallas_src>
import functools

import jax
import jax.numpy as jnp
from jax.experimental import pallas as pl
from jax.experimental.pallas import tpu as pltpu


def _round_up(x, m):
    return (x + m - 1) // m * m


# ------------------------------ Pallas kernel ------------------------------ #

def fused_conv_bn_relu_pool_kernel(p_ref, w_ref, g_ref, b_ref, m_ref, o_ref,
                                   *, inv_count, mo, eps):
    """Fused conv (im2col matmul) + BN (batch stats) + ReLU + 2x2/2 maxpool.

    p_ref: (K, 4*mo)  im2col patches; the lane dim is the concatenation of the
                      four pooling phases (a,b) in {0,1}^2, each a flattened
                      (N, Ho, Wo) slab padded to `mo` columns.
    w_ref: (Cout, K)  reshaped conv weight.
    g_ref, b_ref: (Cout, 1) BN gamma / beta.
    m_ref: (1, 4*mo)  interior mask: 1 where the grid position is a true conv
                      output, 0 on the pooling pad ring / lane padding.
    o_ref: (Cout, mo) pooled output (flattened (N, Ho, Wo) in lanes).
    """
    # Conv at all four pooling phases as a single MXU matmul (f32 accumulate).
    yc = jnp.dot(w_ref[...], p_ref[...],
                 preferred_element_type=jnp.float32)              # (Cout, 4*mo)

    mask = m_ref[...]                                             # (1, 4*mo)

    # Exact BatchNorm2d batch statistics over the true (N, Hc, Wc) conv outputs
    # (ring / pad columns are masked out).  Biased variance, eps = 1e-5.
    ym = yc * mask
    mean = jnp.sum(ym, axis=1, keepdims=True) * inv_count          # (Cout, 1)
    var = jnp.sum(ym * yc, axis=1, keepdims=True) * inv_count - mean * mean

    # BN folded into one scale/shift, then ReLU.  Conv bias omitted: it is
    # cancelled exactly by the mean subtraction above.
    scale = g_ref[...] * jax.lax.rsqrt(var + eps)                  # (Cout, 1)
    shift = b_ref[...] - mean * scale
    z = jnp.maximum(yc * scale + shift, 0.0) * mask                # ring -> 0

    # MaxPool2d(2,2, stride 2, pad 1): max over the four phases.  Zero padding
    # is equivalent to -inf padding because z >= 0 and every pool window holds
    # at least one real (unmasked) value.  `mo` is a multiple of 128, so every
    # slice below is lane-tile aligned.
    o_ref[...] = jnp.maximum(
        jnp.maximum(z[:, 0 * mo:1 * mo], z[:, 1 * mo:2 * mo]),
        jnp.maximum(z[:, 2 * mo:3 * mo], z[:, 3 * mo:4 * mo]))


# ------------------------------ Host wrapper ------------------------------- #

@functools.partial(jax.jit, static_argnames=("padding",))
def multi_scale_conv_block(x_nchw, weight, bias, gamma, beta, *, padding):
    del bias  # cancelled exactly by train-mode BN mean subtraction
    N, Cin, H, W = x_nchw.shape
    Cout, _, kh, kw = weight.shape
    p = padding

    Hc = H + 2 * p - kh + 1            # conv output size (PyTorch padding=p)
    Wc = W + 2 * p - kw + 1
    Ho = Hc // 2 + 1                   # MaxPool2d(2,2, stride 2, pad 1), floor
    Wo = Wc // 2 + 1

    K = Cin * kh * kw
    Mo = N * Ho * Wo
    Mo_p = _round_up(Mo, 128)          # lane-aligned chunk width

    # NCHW -> NHWC, pad by p+1 so conv can be evaluated on the pool pad ring.
    x = jnp.transpose(x_nchw, (0, 2, 3, 1)).astype(jnp.float32)
    xp = jnp.pad(x, ((0, 0), (p + 1, p + 1), (p + 1, p + 1), (0, 0)))

    # Host im2col, one chunk per pooling phase (a, b): grid position
    # (2*ho + a, 2*wo + b) -> patch tap (di, dj) = xp[n, 2ho+a+di, 2wo+b+dj, :].
    chunks, masks = [], []
    for a in range(2):
        for b in range(2):
            taps = [xp[:, a + di: a + di + 2 * Ho: 2,
                       b + dj: b + dj + 2 * Wo: 2, :]
                    for di in range(kh) for dj in range(kw)]    # (N,Ho,Wo,Cin)
            t = jnp.stack(taps, axis=-1)                        # (N,Ho,Wo,Cin,kh*kw)
            t = t.transpose(3, 4, 0, 1, 2).reshape(K, Mo)       # K = cin*kh*kw+di*kw+dj
            chunks.append(jnp.pad(t, ((0, 0), (0, Mo_p - Mo))))

            gi = 2 * jnp.arange(Ho) + a                         # grid row of phase a
            gj = 2 * jnp.arange(Wo) + b
            m2 = (((gi >= 1) & (gi <= Hc))[:, None]
                  & ((gj >= 1) & (gj <= Wc))[None, :])          # true-conv interior
            m2 = jnp.broadcast_to(m2[None], (N, Ho, Wo)).reshape(1, Mo)
            masks.append(jnp.pad(m2.astype(jnp.float32),
                                 ((0, 0), (0, Mo_p - Mo))))

    patches = jnp.concatenate(chunks, axis=1)                   # (K, 4*Mo_p)
    mask = jnp.concatenate(masks, axis=1)                       # (1, 4*Mo_p)

    w2d = weight.reshape(Cout, K).astype(jnp.float32)           # (Cout, K)
    g2d = gamma.reshape(Cout, 1).astype(jnp.float32)
    b2d = beta.reshape(Cout, 1).astype(jnp.float32)

    kernel = functools.partial(
        fused_conv_bn_relu_pool_kernel,
        inv_count=1.0 / float(N * Hc * Wc), mo=Mo_p, eps=1e-5)

    v = pl.pallas_call(
        kernel,
        out_shape=jax.ShapeDtypeStruct((Cout, Mo_p), jnp.float32),
        grid=(1,),
        in_specs=[
            pl.BlockSpec((K, 4 * Mo_p), lambda i: (0, 0)),
            pl.BlockSpec((Cout, K), lambda i: (0, 0)),
            pl.BlockSpec((Cout, 1), lambda i: (0, 0)),
            pl.BlockSpec((Cout, 1), lambda i: (0, 0)),
            pl.BlockSpec((1, 4 * Mo_p), lambda i: (0, 0)),
        ],
        out_specs=pl.BlockSpec((Cout, Mo_p), lambda i: (0, 0)),
        compiler_params=pltpu.CompilerParams(
            dimension_semantics=("arbitrary",)),
    )(patches, w2d, g2d, b2d, mask)

    # (Cout, N*Ho*Wo) -> NCHW.
    pooled = v[:, :Mo].reshape(Cout, N, Ho, Wo)
    return pooled.transpose(1, 0, 2, 3)


# ----------------------------- Pure-JAX reference -------------------------- #

def reference_forward(x_nchw, weight, bias, gamma, beta, padding, eps=1e-5):
    p = padding
    y = jax.lax.conv_general_dilated(
        x_nchw, weight, window_strides=(1, 1), padding=((p, p), (p, p)),
        dimension_numbers=("NCHW", "OIHW", "NCHW"),
        precision=jax.lax.Precision.HIGHEST)
    y = y + bias[None, :, None, None]
    mean = jnp.mean(y, axis=(0, 2, 3), keepdims=True)
    var = jnp.mean(jnp.square(y - mean), axis=(0, 2, 3), keepdims=True)
    y = (y - mean) / jnp.sqrt(var + eps)
    y = y * gamma[None, :, None, None] + beta[None, :, None, None]
    y = jnp.maximum(y, 0.0)
    y = jax.lax.reduce_window(
        y, -jnp.inf, jax.lax.max,
        window_dimensions=(1, 1, 2, 2), window_strides=(1, 1, 2, 2),
        padding=((0, 0), (0, 0), (1, 1), (1, 1)))
    return y


# ----------------------------------- Main ----------------------------------- #

if __name__ == "__main__":
    # MultiScaleConvBlock(in_channels=4, out_channels=8, kernel_size=3, padding=1)
    N, Cin, H, W = 2, 4, 16, 16
    Cout, ksize, pad = 8, 3, 1

    key = jax.random.PRNGKey(0)
    k_x, k_w, k_b, k_g, k_bt = jax.random.split(key, 5)

    x = jax.random.normal(k_x, (N, Cin, H, W), jnp.float32)
    weight = 0.1 * jax.random.normal(k_w, (Cout, Cin, ksize, ksize), jnp.float32)
    bias = 0.1 * jax.random.normal(k_b, (Cout,), jnp.float32)
    gamma = 1.0 + 0.1 * jax.random.normal(k_g, (Cout,), jnp.float32)
    beta = 0.1 * jax.random.normal(k_bt, (Cout,), jnp.float32)
    # TODO(synk): BatchNorm running-stat updates (training-mode side effect) are
    # not modeled; the returned tensor (normalized with batch stats) is unaffected.

    out = jax.block_until_ready(
        multi_scale_conv_block(x, weight, bias, gamma, beta, padding=pad))
    ref = jax.block_until_ready(
        reference_forward(x, weight, bias, gamma, beta, pad))

    assert out.shape == ref.shape, (out.shape, ref.shape)
    max_err = float(jnp.max(jnp.abs(out - ref)))
    # Tolerance covers the default-precision MXU matmul (bf16 operand rounding,
    # f32 accumulation) in the kernel vs. the HIGHEST-precision reference conv.
    assert jnp.allclose(out, ref, rtol=2e-2, atol=2.5e-2), max_err

    print("KERNEL_OK")
</pallas_src>

<mosaic_0001>
module attributes {stable_mosaic.version = 11 : i64} {
  func.func @fused_conv_bn_relu_pool_kernel(%arg0: i32, %arg1: memref<36x1024xf32, #tpu.memory_space<vmem>>, %arg2: memref<8x36xf32, #tpu.memory_space<vmem>>, %arg3: memref<8x1xf32, #tpu.memory_space<vmem>>, %arg4: memref<8x1xf32, #tpu.memory_space<vmem>>, %arg5: memref<1x1024xf32, #tpu.memory_space<vmem>>, %arg6: memref<8x256xf32, #tpu.memory_space<vmem>>) attributes {dimension_semantics = [#tpu.dimension_semantics<arbitrary>], iteration_bounds = array<i64: 1>, scalar_prefetch = 0 : i64, scratch_operands = 0 : i64, tpu.core_type = #tpu.core_type<tc>, window_params = [{pipeline_mode = #tpu.pipeline_mode<synchronous>, transform_indices = @transform_0, window_bounds = array<i64: 36, 1024>}, {pipeline_mode = #tpu.pipeline_mode<synchronous>, transform_indices = @transform_1, window_bounds = array<i64: 8, 36>}, {pipeline_mode = #tpu.pipeline_mode<synchronous>, transform_indices = @transform_2, window_bounds = array<i64: 8, 1>}, {pipeline_mode = #tpu.pipeline_mode<synchronous>, transform_indices = @transform_3, window_bounds = array<i64: 8, 1>}, {pipeline_mode = #tpu.pipeline_mode<synchronous>, transform_indices = @transform_4, window_bounds = array<i64: 1, 1024>}, {pipeline_mode = #tpu.pipeline_mode<synchronous>, transform_indices = @transform_5, window_bounds = array<i64: 8, 256>}]} {
    %c0 = arith.constant 0 : index
    %c0_0 = arith.constant 0 : index
    %0 = vector.load %arg2[%c0, %c0_0] : memref<8x36xf32, #tpu.memory_space<vmem>>, vector<8x36xf32>
    %c0_1 = arith.constant 0 : index
    %c0_2 = arith.constant 0 : index
    %1 = vector.load %arg1[%c0_1, %c0_2] : memref<36x1024xf32, #tpu.memory_space<vmem>>, vector<36x1024xf32>
    %cst = arith.constant dense<0.000000e+00> : vector<8x1024xf32>
    %2 = tpu.matmul %0, %1, %cst {dimension_numbers = #tpu.dot_dimension_numbers<[1], [0], [0], [1], [0, 0, 1, 1], [], []>} : vector<8x36xf32>, vector<36x1024xf32>, vector<8x1024xf32> -> vector<8x1024xf32>
    %c0_3 = arith.constant 0 : index
    %c0_4 = arith.constant 0 : index
    %3 = vector.load %arg5[%c0_3, %c0_4] : memref<1x1024xf32, #tpu.memory_space<vmem>>, vector<1x1024xf32>
    %4 = vector.broadcast %3 : vector<1x1024xf32> to vector<8x1024xf32>
    %5 = arith.mulf %2, %4 : vector<8x1024xf32>
    %cst_5 = arith.constant dense<0.000000e+00> : vector<8xf32>
    %6 = vector.multi_reduction <add>, %5, %cst_5 [1] : vector<8x1024xf32> to vector<8xf32>
    %7 = vector.shape_cast %6 : vector<8xf32> to vector<8x1xf32>
    %cst_6 = arith.constant 0.001953125 : f32
    %8 = vector.broadcast %cst_6 : f32 to vector<8x1xf32>
    %9 = arith.mulf %7, %8 : vector<8x1xf32>
    %10 = arith.mulf %5, %2 : vector<8x1024xf32>
    %cst_7 = arith.constant dense<0.000000e+00> : vector<8xf32>
    %11 = vector.multi_reduction <add>, %10, %cst_7 [1] : vector<8x1024xf32> to vector<8xf32>
    %12 = vector.shape_cast %11 : vector<8xf32> to vector<8x1xf32>
    %cst_8 = arith.constant 0.001953125 : f32
    %13 = vector.broadcast %cst_8 : f32 to vector<8x1xf32>
    %14 = arith.mulf %12, %13 : vector<8x1xf32>
    %15 = arith.mulf %9, %9 : vector<8x1xf32>
    %16 = arith.subf %14, %15 : vector<8x1xf32>
    %c0_9 = arith.constant 0 : index
    %c0_10 = arith.constant 0 : index
    %17 = vector.load %arg3[%c0_9, %c0_10] : memref<8x1xf32, #tpu.memory_space<vmem>>, vector<8x1xf32>
    %cst_11 = arith.constant 9.99999974E-6 : f32
    %18 = vector.broadcast %cst_11 : f32 to vector<8x1xf32>
    %19 = arith.addf %16, %18 : vector<8x1xf32>
    %20 = math.rsqrt %19 : vector<8x1xf32>
    %21 = arith.mulf %17, %20 : vector<8x1xf32>
    %c0_12 = arith.constant 0 : index
    %c0_13 = arith.constant 0 : index
    %22 = vector.load %arg4[%c0_12, %c0_13] : memref<8x1xf32, #tpu.memory_space<vmem>>, vector<8x1xf32>
    %23 = arith.mulf %9, %21 : vector<8x1xf32>
    %24 = arith.subf %22, %23 : vector<8x1xf32>
    %25 = vector.broadcast %21 : vector<8x1xf32> to vector<8x1024xf32>
    %26 = arith.mulf %2, %25 : vector<8x1024xf32>
    %27 = vector.broadcast %24 : vector<8x1xf32> to vector<8x1024xf32>
    %28 = arith.addf %26, %27 : vector<8x1024xf32>
    %cst_14 = arith.constant 0.000000e+00 : f32
    %29 = vector.broadcast %cst_14 : f32 to vector<8x1024xf32>
    %30 = arith.maximumf %28, %29 : vector<8x1024xf32>
    %31 = vector.broadcast %3 : vector<1x1024xf32> to vector<8x1024xf32>
    %32 = arith.mulf %30, %31 : vector<8x1024xf32>
    %33 = vector.extract_strided_slice %32 {offsets = [0, 0], sizes = [8, 256], strides = [1, 1]} : vector<8x1024xf32> to vector<8x256xf32>
    %34 = vector.extract_strided_slice %32 {offsets = [0, 256], sizes = [8, 256], strides = [1, 1]} : vector<8x1024xf32> to vector<8x256xf32>
    %35 = arith.maximumf %33, %34 : vector<8x256xf32>
    %36 = vector.extract_strided_slice %32 {offsets = [0, 512], sizes = [8, 256], strides = [1, 1]} : vector<8x1024xf32> to vector<8x256xf32>
    %37 = vector.extract_strided_slice %32 {offsets = [0, 768], sizes = [8, 256], strides = [1, 1]} : vector<8x1024xf32> to vector<8x256xf32>
    %38 = arith.maximumf %36, %37 : vector<8x256xf32>
    %39 = arith.maximumf %35, %38 : vector<8x256xf32>
    %c0_15 = arith.constant 0 : index
    %c0_16 = arith.constant 0 : index
    %40 = vector.load %arg6[%c0_15, %c0_16] : memref<8x256xf32, #tpu.memory_space<vmem>>, vector<8x256xf32>
    tpu.vector_store %arg6[%c0_15, %c0_16], %39 {strides = array<i32>} : memref<8x256xf32, #tpu.memory_space<vmem>>, vector<8x256xf32>,
    return
  }
  func.func @transform_0(%arg0: i32) -> (i32, i32) {
    %c0_i32 = arith.constant 0 : i32
    %c0_i32_0 = arith.constant 0 : i32
    %c0_i32_1 = arith.constant 0 : i32
    return %c0_i32, %c0_i32_0 : i32, i32
  }
  func.func @transform_1(%arg0: i32) -> (i32, i32) {
    %c0_i32 = arith.constant 0 : i32
    %c0_i32_0 = arith.constant 0 : i32
    %c0_i32_1 = arith.constant 0 : i32
    return %c0_i32, %c0_i32_0 : i32, i32
  }
  func.func @transform_2(%arg0: i32) -> (i32, i32) {
    %c0_i32 = arith.constant 0 : i32
    %c0_i32_0 = arith.constant 0 : i32
    %c0_i32_1 = arith.constant 0 : i32
    return %c0_i32, %c0_i32_0 : i32, i32
  }
  func.func @transform_3(%arg0: i32) -> (i32, i32) {
    %c0_i32 = arith.constant 0 : i32
    %c0_i32_0 = arith.constant 0 : i32
    %c0_i32_1 = arith.constant 0 : i32
    return %c0_i32, %c0_i32_0 : i32, i32
  }
  func.func @transform_4(%arg0: i32) -> (i32, i32) {
    %c0_i32 = arith.constant 0 : i32
    %c0_i32_0 = arith.constant 0 : i32
    %c0_i32_1 = arith.constant 0 : i32
    return %c0_i32, %c0_i32_0 : i32, i32
  }
  func.func @transform_5(%arg0: i32) -> (i32, i32) {
    %c0_i32 = arith.constant 0 : i32
    %c0_i32_0 = arith.constant 0 : i32
    %c0_i32_1 = arith.constant 0 : i32
    return %c0_i32, %c0_i32_0 : i32, i32
  }
}

</mosaic_0001>

<bundles_post_ra>
// kernel: multi_scale_conv_block.1
= control target key start
LH: loop header
LB: loop body
LE: loop exit
PB: predicated region body
PF: predicated region fallthrough
CT: control target
= control target key end

     0   :  { %vm65_vm0 = vcmask 1043456   ;;  %v533_v3 = vmov 0.0   ;;  %vm61_vm1 = vcmask 293888   ;;  %v376_v42 = vlaneseq  ;;  %s771_s0 = inlined_call_operand.vmem [shape: f32[36,1024], index: 0, kind: input, shape index: {}]   ;;  %s772_s1 = inlined_call_operand.vmem [shape: f32[8,36], index: 1, kind: input, shape index: {}]   ;;  %s773_s4 = inlined_call_operand.vmem [shape: f32[1,1024], index: 4, kind: input, shape index: {}]   ;;  %s774_s2 = inlined_call_operand.vmem [shape: f32[8,1], index: 2, kind: input, shape index: {}]   ;;  %s775_s3 = inlined_call_operand.vmem [shape: f32[8,1], index: 3, kind: input, shape index: {}]   ;;  %s776_s5 = inlined_call_operand.vmem [shape: f32[8,256], index: 5, kind: output, shape index: {}]  }
   0x1   :  { %v54_v0 = vld [vmem:[%s771_s0 + $0x108] sm:$0xf]  ;;  %v56_v1 = vld [vmem:[%s771_s0 + $0x118] sm:$0xf]  ;;  %v53_v2 = vld [vmem:[%s771_s0 + $0x100] sm:$0xf]  ;;  %154 = vmatprep.mubr.f32.mxu0 %v533_v3  ;;  %225 = vmatprep.mubr.f32.mxu1 %v533_v3 }
   0x2   :  { %515 = vmatprep.subr.msk.mxu0 %vm65_vm0, %v54_v0  ;;  %518 = vmatprep.subr.msk.mxu1 %vm65_vm0, %v56_v1  ;;  %v55_v4 = vld [vmem:[%s771_s0 + $0x110] sm:$0xf]  ;;  %v46_v5 = vld [vmem:[%s771_s0 + $0xc8] sm:$0xff]  ;;  %v48_v6 = vld [vmem:[%s771_s0 + $0xd8] sm:$0xff]  ;;  %v377_v43 = vshrl.u32 %v376_v42, 7 }
   0x3   :  { %516 = vmatpush1.msk.msra.mxu0 %vm65_vm0, %v53_v2  ;;  %519 = vmatpush1.msk.msra.mxu1 %vm65_vm0, %v55_v4  ;;  %v45_v7 = vld [vmem:[%s771_s0 + $0xc0] sm:$0xff]  ;;  %v47_v8 = vld [vmem:[%s771_s0 + $0xd0] sm:$0xff]  ;;  %v38_v9 = vld [vmem:[%s771_s0 + $0x88] sm:$0xff] }
   0x4   :  { %114 = vmatprep.subr.mxu0 %v46_v5  ;;  %185 = vmatprep.subr.mxu1 %v48_v6  ;;  %v40_v10 = vld [vmem:[%s771_s0 + $0x98] sm:$0xff]  ;;  %v37_v11 = vld [vmem:[%s771_s0 + $0x80] sm:$0xff]  ;;  %v39_v12 = vld [vmem:[%s771_s0 + $0x90] sm:$0xff]  ;;  %v378_v44 = vsub.s32 0, %v377_v43  ;;  %v386_v46 = vsub.s32 2, %v377_v43  ;;  %v382_v47 = vsub.s32 1, %v377_v43 }
   0x5   :  { %115 = vmatpush1.msra.mxu0 %v45_v7  ;;  %186 = vmatpush1.msra.mxu1 %v47_v8  ;;  %v30_v13 = vld [vmem:[%s771_s0 + $0x48] sm:$0xff]  ;;  %v32_v14 = vld [vmem:[%s771_s0 + $0x58] sm:$0xff]  ;;  %v29_v15 = vld [vmem:[%s771_s0 + $0x40] sm:$0xff]  ;;  %v390_v52 = vsub.s32 3, %v377_v43  ;;  %v394_v63 = vsub.s32 4, %v377_v43  ;;  %v402_v2 = vsub.s32 6, %v377_v43 }
   0x6   :  { %116 = vmatprep.subr.mxu0 %v38_v9  ;;  %187 = vmatprep.subr.mxu1 %v40_v10  ;;  %v31_v16 = vld [vmem:[%s771_s0 + $0x50] sm:$0xff]  ;;  %v22_v17 = vld [vmem:[%s771_s0 + $0x8] sm:$0xff]  ;;  %v24_v18 = vld [vmem:[%s771_s0 + $0x18] sm:$0xff]  ;;  %v406_v8 = vsub.s32 7, %v377_v43 }
   0x7   :  { %117 = vmatpush1.msra.mxu0 %v37_v11  ;;  %188 = vmatpush1.msra.mxu1 %v39_v12  ;;  %v21_v19 = vld [vmem:[%s771_s0] sm:$0xff]  ;;  %v23_v20 = vld [vmem:[%s771_s0 + $0x10] sm:$0xff]  ;;  %v58_v22 = vld [vmem:[%s771_s0 + $0x128] sm:$0xf] }
   0x8   :  { %118 = vmatprep.subr.mxu0 %v30_v13  ;;  %189 = vmatprep.subr.mxu1 %v32_v14  ;;  %v20_v21 = vld [vmem:[%s772_s1] sm:$0xff]  ;;  %v60_v23 = vld [vmem:[%s771_s0 + $0x138] sm:$0xf]  ;;  %v59_v25 = vld [vmem:[%s771_s0 + $0x130] sm:$0xf] }
   0x9   :  { %119 = vmatpush1.msra.mxu0 %v29_v15  ;;  %190 = vmatpush1.msra.mxu1 %v31_v16  ;;  %v57_v24 = vld [vmem:[%s771_s0 + $0x120] sm:$0xf]  ;;  %v50_v26 = vld [vmem:[%s771_s0 + $0xe8] sm:$0xff]  ;;  %v52_v27 = vld [vmem:[%s771_s0 + $0xf8] sm:$0xff] }
   0xa   :  { %120 = vmatprep.subr.mxu0 %v22_v17  ;;  %191 = vmatprep.subr.mxu1 %v24_v18  ;;  %v49_v28 = vld [vmem:[%s771_s0 + $0xe0] sm:$0xff]  ;;  %v51_v29 = vld [vmem:[%s771_s0 + $0xf0] sm:$0xff]  ;;  %v42_v30 = vld [vmem:[%s771_s0 + $0xa8] sm:$0xff] }
   0xb   :  { %121 = vmatpush1.msra.mxu0 %v21_v19  ;;  %192 = vmatpush1.msra.mxu1 %v23_v20  ;;  %v44_v31 = vld [vmem:[%s771_s0 + $0xb8] sm:$0xff]  ;;  %v41_v32 = vld [vmem:[%s771_s0 + $0xa0] sm:$0xff]  ;;  %v43_v33 = vld [vmem:[%s771_s0 + $0xb0] sm:$0xff] }
   0xc   :  { %517 = vmatmul.mubr.msk.f32.vlgmr.msra.gmra.mxu0 %vm61_vm1, %v20_v21  ;;  %521 = vmatprep.subr.msk.mxu0 %vm65_vm0, %v58_v22  ;;  %v34_v34 = vld [vmem:[%s771_s0 + $0x68] sm:$0xff]  ;;  %v36_v35 = vld [vmem:[%s771_s0 + $0x78] sm:$0xff]  ;;  %v33_v36 = vld [vmem:[%s771_s0 + $0x60] sm:$0xff] }
   0xd   :  { %524 = vmatprep.subr.msk.mxu1 %vm65_vm0, %v60_v23  ;;  %520 = vmatmul.mubr.msk.f32.vlgmr.msra.gmra.mxu1 %vm61_vm1, %v20_v21  ;;  %v35_v37 = vld [vmem:[%s771_s0 + $0x70] sm:$0xff]  ;;  %v26_v38 = vld [vmem:[%s771_s0 + $0x28] sm:$0xff]  ;;  %v28_v39 = vld [vmem:[%s771_s0 + $0x38] sm:$0xff] }
   0xe   :  { %522 = vmatpush1.msk.msra.mxu0 %vm65_vm0, %v57_v24  ;;  %525 = vmatpush1.msk.msra.mxu1 %vm65_vm0, %v59_v25  ;;  %v25_v40 = vld [vmem:[%s771_s0 + $0x20] sm:$0xff]  ;;  %v27_v41 = vld [vmem:[%s771_s0 + $0x30] sm:$0xff] }
   0xf   :  { %256 = vmatprep.subr.mxu0 %v50_v26  ;;  %327 = vmatprep.subr.mxu1 %v52_v27  ;;  %v374_v45 = vld [vmem:[%s773_s4] sm:$0xff] }
  0x10   :  { %257 = vmatpush1.msra.mxu0 %v49_v28  ;;  %328 = vmatpush1.msra.mxu1 %v51_v29  ;;  %v707_v48 = vrot.slane %v374_v45, %v378_v44  ;;  %v709_v49 = vrot.slane %v374_v45, %v386_v46  ;;  %v711_v50 = vrot.slane %v374_v45, %v382_v47  ;;  %v458_v46 = vld [vmem:[%s775_s3] sm:$0xff] }
  0x11   :  { %258 = vmatprep.subr.mxu0 %v42_v30  ;;  %329 = vmatprep.subr.mxu1 %v44_v31  ;;  %v725_v58 = vrot.slane %v374_v45, %v390_v52  ;;  %v734_v6 = vrot.slane %v374_v45, %v394_v63  ;;  %v736_v9 = vrot.slane %v374_v45, %v402_v2 }
  0x12   :  { %259 = vmatpush1.msra.mxu0 %v41_v32  ;;  %330 = vmatpush1.msra.mxu1 %v43_v33  ;;  %v742_v18 = vrot.slane %v374_v45, %v406_v8 }
  0x13   :  { %260 = vmatprep.subr.mxu0 %v34_v34  ;;  %331 = vmatprep.subr.mxu1 %v36_v35  ;;  %v534_v35 = vmov 0  }
  0x14   :  { %261 = vmatpush1.msra.mxu0 %v33_v36  ;;  %332 = vmatpush1.msra.mxu1 %v35_v37 }
  0x15   :  { %262 = vmatprep.subr.mxu0 %v26_v38  ;;  %333 = vmatprep.subr.mxu1 %v28_v39 }
  0x16   :  { %263 = vmatpush1.msra.mxu0 %v25_v40  ;;  %296 = vmatprep.mubr.f32.mxu0 %v533_v3 }
  0x17   :  { %334 = vmatpush1.msra.mxu1 %v27_v41  ;;  %367 = vmatprep.mubr.f32.mxu1 %v533_v3  ;;  %v398_v3 = vsub.s32 5, %v377_v43  ;;  %v454_v43 = vld [vmem:[%s774_s2] sm:$0xff] }
  0x18   :  { %523 = vmatmul.mubr.msk.f32.vlgmr.msra.gmra.mxu0 %vm61_vm1, %v20_v21  ;;  %526 = vmatmul.mubr.msk.f32.vlgmr.msra.gmra.mxu1 %vm61_vm1, %v20_v21 }
  0x19   :  { %v738_v10 = vrot.slane %v374_v45, %v398_v3  ;;  %529 = vset.pattern.permute.xlu1 %v534_v35  ;;  %530 = vset.pattern.permute.xlu0 %v534_v35 }
  0xcc   :  { %v713_v51 = vpop.f32.mrf.mxu0 }
  0xcd   :  { %v416_v53 = vmul.f32 %v707_v48, %v713_v51  ;;  %v717_v54 = vpop.f32.mrf.mxu1 }
  0xce   :  { %v418_v55 = vmul.f32 %v709_v49, %v717_v54  ;;  %v721_v56 = vpop.f32.mrf.mxu0 }
  0xcf   :  { %v417_v57 = vmul.f32 %v711_v50, %v721_v56  ;;  %v434_v59 = vmul.f32 %v416_v53, %v713_v51  ;;  %v729_v62 = vpop.f32.mrf.mxu1 }
  0xd0   :  { %v436_v0 = vmul.f32 %v418_v55, %v717_v54  ;;  %v419_v4 = vmul.f32 %v725_v58, %v729_v62 }
  0xd1   :  { %v424_v60 = vadd.f32 %v417_v57, %v416_v53  ;;  %v435_v61 = vmul.f32 %v417_v57, %v721_v56 }
  0xd2   :  { %v437_v11 = vmul.f32 %v419_v4, %v729_v62 }
  0xd3   :  { %v442_v1 = vadd.f32 %v435_v61, %v434_v59  ;;  %v425_v5 = vadd.f32 %v424_v60, %v418_v55 }
  0xd5   :  { %v443_v7 = vadd.f32 %v442_v1, %v436_v0  ;;  %v426_v14 = vadd.f32 %v425_v5, %v419_v4 }
  0xd7   :  { %v444_v16 = vadd.f32 %v443_v7, %v437_v11 }
  0xd8   :  { %v298_v12 = vpop.f32.mrf.mxu0  ;;  %v369_v13 = vpop.f32.mrf.mxu1 }
  0xd9   :  { %v420_v15 = vmul.f32 %v734_v6, %v298_v12  ;;  %v422_v21 = vmul.f32 %v736_v9, %v369_v13 }
  0xda   :  { %v300_v17 = vpop.f32.mrf.mxu0  ;;  %v371_v23 = vpop.f32.mrf.mxu1 }
  0xdb   :  { %v427_v19 = vadd.f32 %v426_v14, %v420_v15  ;;  %v438_v20 = vmul.f32 %v420_v15, %v298_v12  ;;  %v421_v22 = vmul.f32 %v738_v10, %v300_v17  ;;  %v440_v27 = vmul.f32 %v422_v21, %v369_v13 }
  0xdc   :  { %v423_v29 = vmul.f32 %v742_v18, %v371_v23 }
  0xdd   :  { %v445_v24 = vadd.f32 %v444_v16, %v438_v20  ;;  %v428_v25 = vadd.f32 %v427_v19, %v421_v22  ;;  %v439_v26 = vmul.f32 %v421_v22, %v300_v17 }
  0xde   :  { %v441_v33 = vmul.f32 %v423_v29, %v371_v23 }
  0xdf   :  { %v446_v28 = vadd.f32 %v445_v24, %v439_v26  ;;  %v429_v30 = vadd.f32 %v428_v25, %v422_v21 }
  0xe1   :  { %v430_v31 = vadd.f32 %v429_v30, %v423_v29  ;;  %v447_v32 = vadd.f32 %v446_v28, %v440_v27 }
  0xe3   :  { %431 = vadd.xlane.f32.xlu0 %v430_v31  ;;  %v448_v34 = vadd.f32 %v447_v32, %v441_v33 }
  0xe7   :  { %449 = vadd.xlane.f32.xlu0 %v448_v34 }
 0x16c   :  { %v432_v36 = vpop.xlane.xlu0 %431 }
 0x16d   :  { %v433_v37 = vmul.f32 0.001953125, %v432_v36 }
 0x16f   :  { %v452_v39 = vmul.f32 %v433_v37, %v433_v37 }
 0x170   :  { %v450_v38 = vpop.xlane.xlu0 %449 }
 0x171   :  { %v451_v40 = vmul.f32 0.001953125, %v450_v38 }
 0x173   :  { %v453_v41 = vsub.f32 %v451_v40, %v452_v39 }
 0x175   :  { %v455_v42 = vadd.f32 1e-05, %v453_v41 }
 0x177   :  { %531 = vrsqrt.f32 %v455_v42 }
 0x184   :  { %v532_v44 = vpop.eup %531 }
 0x185   :  { %v457_v45 = vmul.f32 %v532_v44, %v454_v43 }
 0x187   :  { %463 = vperm.xlu1 %529, %v457_v45   ;;  %v459_v47 = vmul.f32 %v457_v45, %v433_v37 }
 0x189   :  { %v460_v52 = vsub.f32 %v458_v46, %v459_v47 }
 0x18b   :  { %476 = vperm.xlu1 %529, %v460_v52  }
 0x202   :  { %v464_v53 = vpop.permute.xlu1 %463 }
 0x203   :  { %v466_v55 = vmul.f32 %v464_v53, %v713_v51  ;;  %v467_v57 = vmul.f32 %v464_v53, %v721_v56  ;;  %v468_v59 = vmul.f32 %v464_v53, %v717_v54  ;;  %v469_v60 = vmul.f32 %v464_v53, %v729_v62 }
 0x204   :  { %v470_v61 = vmul.f32 %v464_v53, %v298_v12  ;;  %v471_v63 = vmul.f32 %v464_v53, %v300_v17  ;;  %v472_v0 = vmul.f32 %v464_v53, %v369_v13  ;;  %v473_v1 = vmul.f32 %v464_v53, %v371_v23 }
 0x206   :  { %v477_v2 = vpop.permute.xlu1 %476 }
 0x207   :  { %v479_v3 = vadd.f32 %v477_v2, %v466_v55  ;;  %v480_v4 = vadd.f32 %v477_v2, %v467_v57  ;;  %v481_v5 = vadd.f32 %v477_v2, %v468_v59  ;;  %v482_v7 = vadd.f32 %v477_v2, %v469_v60 }
 0x208   :  { %v483_v8 = vadd.f32 %v477_v2, %v470_v61  ;;  %v484_v11 = vadd.f32 %v477_v2, %v471_v63  ;;  %v485_v14 = vadd.f32 %v477_v2, %v472_v0  ;;  %v486_v15 = vadd.f32 %v477_v2, %v473_v1 }
 0x209   :  { %v487_v51 = vmax.f32 %v479_v3, 0.0  ;;  %v488_v16 = vmax.f32 %v480_v4, 0.0  ;;  %v489_v56 = vmax.f32 %v481_v5, 0.0  ;;  %v490_v19 = vmax.f32 %v482_v7, 0.0 }
 0x20a   :  { %v491_v54 = vmax.f32 %v483_v8, 0.0  ;;  %v492_v20 = vmax.f32 %v484_v11, 0.0  ;;  %v493_v62 = vmax.f32 %v485_v14, 0.0  ;;  %v494_v12 = vmax.f32 %v486_v15, 0.0 }
 0x20b   :  { %v495_v13 = vmul.f32 %v487_v51, %v707_v48  ;;  %v496_v17 = vmul.f32 %v488_v16, %v711_v50  ;;  %v497_v21 = vmul.f32 %v489_v56, %v709_v49  ;;  %v498_v22 = vmul.f32 %v490_v19, %v725_v58 }
 0x20c   :  { %v499_v23 = vmul.f32 %v491_v54, %v734_v6  ;;  %v500_v24 = vmul.f32 %v492_v20, %v738_v10  ;;  %v501_v25 = vmul.f32 %v493_v62, %v736_v9  ;;  %v502_v26 = vmul.f32 %v494_v12, %v742_v18 }
 0x20d   :  { %v503_v27 = vmax.f32 %v495_v13, %v497_v21  ;;  %v504_v28 = vmax.f32 %v496_v17, %v498_v22 }
 0x20e   :  { %v505_v29 = vmax.f32 %v499_v23, %v501_v25  ;;  %v506_v30 = vmax.f32 %v500_v24, %v502_v26 }
 0x210   :  { %v507_v31 = vmax.f32 %v503_v27, %v505_v29  ;;  %v508_v48 = vmax.f32 %v504_v28, %v506_v30 }
 0x212   :  { %509 = vst [vmem:[%s776_s5] sm:$0xff] %v507_v31  ;;  %510 = vst [vmem:[%s776_s5 + $0x8] sm:$0xff] %v508_v48 }

</bundles_post_ra>
